<compile_context>
chip_gen: v6e
topology: v6e:2x2x1
jax: 0.10.0
libtpu: 0.0.40
codegen_flags: <defaults>
</compile_context>

<pallas_src>
import math
from functools import partial

import jax
import jax.numpy as jnp
from jax.experimental import pallas as pl
from jax.experimental.pallas import tpu as pltpu


# --------------------------------------------------------------------------- #
# Small host-side helpers
# --------------------------------------------------------------------------- #
def _cdiv(a, b):
    return -(-a // b)


def _sublane_multiple(*dtypes):
    """Minimum row-tile multiple so (rows, lanes) blocks respect dtype packing."""
    m = 8
    for dt in dtypes:
        m = max(m, 32 // jnp.dtype(dt).itemsize)   # f32: 8, bf16: 16, int8/fp8: 32
    return m


def _vmem_limit_bytes():
    """Scoped-VMEM limit sized per generation (v7x has 64 MiB physical VMEM)."""
    cap = None
    try:
        cap = getattr(pltpu.get_tpu_info(), "vmem_capacity_bytes", None)
    except Exception:
        cap = None
    if not cap:
        cap = 64 * 1024 * 1024            # conservative default: v7x physical VMEM
    return int(min(cap // 2, 64 * 1024 * 1024))


def _pick_tile_rows(n_rows, stream_bytes_per_row, feat_row_bytes, sublane,
                    vmem_budget, block_cap_bytes=4 << 20):
    """Rows per grid step: as large as the VMEM budget allows (stream_bytes_per_row
    already accounts for double-buffering), capped at ~4 MiB per feat block and at
    >= ~4 grid steps (keeps v7x megacore sharding + pipelining alive)."""
    tile = vmem_budget // max(stream_bytes_per_row, 1)
    tile = min(tile, block_cap_bytes // max(feat_row_bytes, 1))
    tile = min(tile, max(_cdiv(n_rows, 4), sublane))
    if tile >= n_rows:
        return n_rows
    return max((tile // sublane) * sublane, sublane)


# --------------------------------------------------------------------------- #
# In-kernel helpers
# --------------------------------------------------------------------------- #
def _fold_totals(v, c):
    """Sum the fold = fc // c lane groups of a (1, fc) vector, replicating the
    per-channel totals into every group (stays lane-dense; XLU roll + VPU add)."""
    fc = v.shape[-1]
    shift = c
    while shift < fc:                      # log2(fold) steps, fold is a power of 2
        v = v + pltpu.roll(v, shift=shift, axis=1)
        shift *= 2
    return v


def _scale_offset(sum_v, sq_v, gamma, beta, *, eps, n_total, c):
    """Fold per-lane sums into per-channel stats and fuse the BN affine."""
    s = _fold_totals(sum_v, c)
    q = _fold_totals(sq_v, c)
    inv_n = jnp.float32(1.0 / n_total)
    mean = s * inv_n
    var = jnp.maximum(q * inv_n - mean * mean, 0.0)     # biased (training) variance
    a = gamma * jax.lax.rsqrt(var + eps)
    return a, beta - mean * a


def _modulate(y, ctx, w_shift, w_scale, b_shift, b_scale1):
    h = ctx * jax.nn.sigmoid(ctx)                        # SiLU
    shift = jnp.dot(h, w_shift, preferred_element_type=jnp.float32) + b_shift
    scale1 = jnp.dot(h, w_scale, preferred_element_type=jnp.float32) + b_scale1
    return y * scale1 + shift


# --------------------------------------------------------------------------- #
# Pass 1: per-channel batch statistics -> fused scale/offset (a, b)
# --------------------------------------------------------------------------- #
def _stats_kernel(feat_ref, gamma_ref, beta_ref, a_ref, b_ref, sum_sc, sq_sc,
                  *, eps, n_total, n_rows, tile_rows, c):
    i = pl.program_id(0)
    last = pl.num_programs(0) - 1

    @pl.when(i == 0)
    def _init():
        sum_sc[...] = jnp.zeros_like(sum_sc)
        sq_sc[...] = jnp.zeros_like(sq_sc)

    x = feat_ref[...].astype(jnp.float32)                # [tile_rows, fc], f32 accum

    def _accumulate(xv):
        sum_sc[...] += jnp.sum(xv, axis=0, keepdims=True)
        sq_sc[...] += jnp.sum(xv * xv, axis=0, keepdims=True)

    if n_rows % tile_rows != 0:
        # Only the last (partial) block needs the row mask; full blocks skip it.
        @pl.when(i != last)
        def _full():
            _accumulate(x)

        @pl.when(i == last)
        def _partial():
            rows = i * tile_rows + jax.lax.broadcasted_iota(jnp.int32, x.shape, 0)
            _accumulate(jnp.where(rows < n_rows, x, 0.0))
    else:
        _accumulate(x)

    @pl.when(i == last)
    def _finalize():
        a, b = _scale_offset(sum_sc[...], sq_sc[...], gamma_ref[...], beta_ref[...],
                             eps=eps, n_total=n_total, c=c)
        a_ref[...] = a
        b_ref[...] = b


# --------------------------------------------------------------------------- #
# Pass 2: normalize (+ optional adaptive modulation)
# --------------------------------------------------------------------------- #
def _apply_kernel(feat_ref, a_ref, b_ref, o_ref):
    x = feat_ref[...].astype(jnp.float32)
    o_ref[...] = (x * a_ref[...] + b_ref[...]).astype(o_ref.dtype)


def _apply_adaptive_kernel(feat_ref, ctx_ref, a_ref, b_ref,
                           w_shift_ref, w_scale_ref, b_shift_ref, b_scale1_ref,
                           o_ref):
    x = feat_ref[...].astype(jnp.float32)
    y = x * a_ref[...] + b_ref[...]
    out = _modulate(y, ctx_ref[...].astype(jnp.float32),
                    w_shift_ref[...], w_scale_ref[...],
                    b_shift_ref[...], b_scale1_ref[...])
    o_ref[...] = out.astype(o_ref.dtype)


# --------------------------------------------------------------------------- #
# Fused single-pass path (whole batch resident in VMEM: one HBM read of feat)
# --------------------------------------------------------------------------- #
def _fused_kernel(feat_ref, gamma_ref, beta_ref, o_ref, *, eps, n_total, c):
    x = feat_ref[...].astype(jnp.float32)
    s = jnp.sum(x, axis=0, keepdims=True)
    q = jnp.sum(x * x, axis=0, keepdims=True)
    a, b = _scale_offset(s, q, gamma_ref[...], beta_ref[...],
                         eps=eps, n_total=n_total, c=c)
    o_ref[...] = (feat_ref[...].astype(jnp.float32) * a + b).astype(o_ref.dtype)


def _fused_adaptive_kernel(feat_ref, ctx_ref, gamma_ref, beta_ref,
                           w_shift_ref, w_scale_ref, b_shift_ref, b_scale1_ref,
                           o_ref, *, eps, n_total, c):
    x = feat_ref[...].astype(jnp.float32)
    s = jnp.sum(x, axis=0, keepdims=True)
    q = jnp.sum(x * x, axis=0, keepdims=True)
    a, b = _scale_offset(s, q, gamma_ref[...], beta_ref[...],
                         eps=eps, n_total=n_total, c=c)
    y = feat_ref[...].astype(jnp.float32) * a + b
    out = _modulate(y, ctx_ref[...].astype(jnp.float32),
                    w_shift_ref[...], w_scale_ref[...],
                    b_shift_ref[...], b_scale1_ref[...])
    o_ref[...] = out.astype(o_ref.dtype)


# --------------------------------------------------------------------------- #
# Module wrapper
# --------------------------------------------------------------------------- #
class PDBatchNorm:
    def __init__(self, num_features, context_channels=256, eps=1e-3, momentum=0.01,
                 conditions=("ScanNet", "S3DIS", "Structured3D"), decouple=True,
                 adaptive=False, affine=True, key=None, use_fused=None):
        self.num_features = num_features
        self.context_channels = context_channels
        self.eps = float(eps)
        self.momentum = momentum          # TODO(synk): running-stat updates not materialized
        self.conditions = conditions
        self.decouple = decouple
        self.adaptive = adaptive
        self.affine = affine
        self.use_fused = use_fused        # None/True = auto (fits-in-VMEM), False = two-pass

        self._vmem_limit = _vmem_limit_bytes()
        self._affine_cache = {}
        self._mod_cache = {}

        n_bn = len(conditions) if decouple else 1
        # BatchNorm1d init: weight=1, bias=0 (affine=False behaves identically in fwd).
        self.gammas = [jnp.ones((1, num_features), jnp.float32) for _ in range(n_bn)]
        self.betas = [jnp.zeros((1, num_features), jnp.float32) for _ in range(n_bn)]

        if self.adaptive:
            if key is None:
                key = jax.random.PRNGKey(0)
            kw, kb = jax.random.split(key)
            c = num_features
            bound = 1.0 / math.sqrt(context_channels)        # PyTorch Linear default init
            # torch Linear weight is [2C, CC]; rows [:C] -> shift, rows [C:] -> scale.
            w = jax.random.uniform(kw, (2 * c, context_channels), jnp.float32,
                                   -bound, bound)
            b = jax.random.uniform(kb, (2 * c,), jnp.float32, -bound, bound)
            # Pre-split + pre-transpose so each dot result is lane-aligned [rows, C].
            self.w_shift = jnp.transpose(w[:c, :])           # [CC, C]
            self.w_scale = jnp.transpose(w[c:, :])           # [CC, C]
            self.b_shift = b[:c].reshape(1, c)
            self.b_scale1 = b[c:].reshape(1, c) + 1.0        # "+1.0" folded into bias

    # ------------------------- folded parameter views ------------------------ #
    def _folded_affine(self, idx, fold):
        key = (idx, fold)
        if key not in self._affine_cache:
            g, b = self.gammas[idx], self.betas[idx]
            if fold > 1:
                g, b = jnp.tile(g, (1, fold)), jnp.tile(b, (1, fold))
            self._affine_cache[key] = (g, b)
        return self._affine_cache[key]

    def _folded_modulation(self, fold):
        if fold not in self._mod_cache:
            if fold == 1:
                vals = (self.w_shift, self.w_scale, self.b_shift, self.b_scale1)
            else:
                cc, c = self.w_shift.shape
                w_sh = jnp.zeros((fold * cc, fold * c), jnp.float32)
                w_sc = jnp.zeros((fold * cc, fold * c), jnp.float32)
                for f in range(fold):                         # block-diagonal fold
                    w_sh = w_sh.at[f * cc:(f + 1) * cc, f * c:(f + 1) * c].set(self.w_shift)
                    w_sc = w_sc.at[f * cc:(f + 1) * cc, f * c:(f + 1) * c].set(self.w_scale)
                vals = (w_sh, w_sc,
                        jnp.tile(self.b_shift, (1, fold)),
                        jnp.tile(self.b_scale1, (1, fold)))
            self._mod_cache[fold] = vals
        return self._mod_cache[fold]

    # ------------------------------- pass 1 ---------------------------------- #
    def _stats_call(self, feat_f, gamma_f, beta_f, n_total):
        n_rows, fc = feat_f.shape
        c = self.num_features
        it = feat_f.dtype.itemsize
        sublane = _sublane_multiple(feat_f.dtype)
        tile = _pick_tile_rows(n_rows, 2 * fc * it, fc * it, sublane,
                               self._vmem_limit // 2)
        grid_n = _cdiv(n_rows, tile)
        return pl.pallas_call(
            partial(_stats_kernel, eps=self.eps, n_total=n_total, n_rows=n_rows,
                    tile_rows=tile, c=c),
            out_shape=(jax.ShapeDtypeStruct((1, fc), jnp.float32),
                       jax.ShapeDtypeStruct((1, fc), jnp.float32)),
            grid=(grid_n,),
            in_specs=[
                pl.BlockSpec((tile, fc), lambda i: (i, 0)),   # feat, streamed over N
                pl.BlockSpec((1, fc), lambda i: (0, 0)),      # gamma (resident)
                pl.BlockSpec((1, fc), lambda i: (0, 0)),      # beta  (resident)
            ],
            out_specs=(pl.BlockSpec((1, fc), lambda i: (0, 0)),
                       pl.BlockSpec((1, fc), lambda i: (0, 0))),
            scratch_shapes=[pltpu.VMEM((1, fc), jnp.float32),
                            pltpu.VMEM((1, fc), jnp.float32)],
            compiler_params=pltpu.CompilerParams(
                dimension_semantics=("arbitrary",),           # N reduction axis
                vmem_limit_bytes=self._vmem_limit),
            cost_estimate=pl.CostEstimate(
                flops=int(3 * n_rows * fc), transcendentals=0,
                bytes_accessed=int(n_rows * fc * it + 8 * fc * 4)),
        )(feat_f, gamma_f, beta_f)

    # ------------------------------- pass 2 ---------------------------------- #
    def _apply_call(self, feat_f, a, b, ctx_f, mod):
        n_rows, fc = feat_f.shape
        f_it = feat_f.dtype.itemsize
        budget = self._vmem_limit // 2

        if not self.adaptive:
            sublane = _sublane_multiple(feat_f.dtype)
            tile = _pick_tile_rows(n_rows, 2 * 2 * fc * f_it, fc * f_it, sublane, budget)
            grid_n = _cdiv(n_rows, tile)
            return pl.pallas_call(
                _apply_kernel,
                out_shape=jax.ShapeDtypeStruct((n_rows, fc), feat_f.dtype),
                grid=(grid_n,),
                in_specs=[
                    pl.BlockSpec((tile, fc), lambda i: (i, 0)),   # feat
                    pl.BlockSpec((1, fc), lambda i: (0, 0)),      # a (resident)
                    pl.BlockSpec((1, fc), lambda i: (0, 0)),      # b (resident)
                ],
                out_specs=pl.BlockSpec((tile, fc), lambda i: (i, 0)),
                compiler_params=pltpu.CompilerParams(
                    dimension_semantics=("parallel",),
                    vmem_limit_bytes=self._vmem_limit),
                cost_estimate=pl.CostEstimate(
                    flops=int(2 * n_rows * fc), transcendentals=0,
                    bytes_accessed=int(2 * n_rows * fc * f_it + 2 * fc * 4)),
            )(feat_f, a, b)

        w_sh, w_sc, b_sh, b_sc1 = mod
        fcc = ctx_f.shape[1]
        c_it = ctx_f.dtype.itemsize
        sublane = _sublane_multiple(feat_f.dtype, ctx_f.dtype)
        stream_row = 2 * (2 * fc * f_it + fcc * c_it)             # dbl-buffered in+out+ctx
        tile = _pick_tile_rows(n_rows, stream_row, fc * f_it, sublane, budget)
        grid_n = _cdiv(n_rows, tile)
        return pl.pallas_call(
            _apply_adaptive_kernel,
            out_shape=jax.ShapeDtypeStruct((n_rows, fc), feat_f.dtype),
            grid=(grid_n,),
            in_specs=[
                pl.BlockSpec((tile, fc), lambda i: (i, 0)),       # feat
                pl.BlockSpec((tile, fcc), lambda i: (i, 0)),      # context
                pl.BlockSpec((1, fc), lambda i: (0, 0)),          # a          (resident)
                pl.BlockSpec((1, fc), lambda i: (0, 0)),          # b          (resident)
                pl.BlockSpec((fcc, fc), lambda i: (0, 0)),        # W_shift_bd (resident)
                pl.BlockSpec((fcc, fc), lambda i: (0, 0)),        # W_scale_bd (resident)
                pl.BlockSpec((1, fc), lambda i: (0, 0)),          # b_shift    (resident)
                pl.BlockSpec((1, fc), lambda i: (0, 0)),          # b_scale+1  (resident)
            ],
            out_specs=pl.BlockSpec((tile, fc), lambda i: (i, 0)),
            compiler_params=pltpu.CompilerParams(
                dimension_semantics=("parallel",),
                vmem_limit_bytes=self._vmem_limit),
            cost_estimate=pl.CostEstimate(
                flops=int(4 * n_rows * fcc * fc + 10 * n_rows * fc),
                transcendentals=int(n_rows * fcc),
                bytes_accessed=int(2 * n_rows * fc * f_it + n_rows * fcc * c_it
                                   + 2 * fcc * fc * 4 + 4 * fc * 4)),
        )(feat_f, ctx_f, a, b, w_sh, w_sc, b_sh, b_sc1)

    # ---------------------------- fused path --------------------------------- #
    def _fused_call(self, feat_f, gamma_f, beta_f, n_total, ctx_f, mod):
        n_rows, fc = feat_f.shape
        c = self.num_features
        if not self.adaptive:
            kernel = partial(_fused_kernel, eps=self.eps, n_total=n_total, c=c)
            in_specs = [pl.BlockSpec((n_rows, fc), lambda i: (0, 0)),
                        pl.BlockSpec((1, fc), lambda i: (0, 0)),
                        pl.BlockSpec((1, fc), lambda i: (0, 0))]
            args = (feat_f, gamma_f, beta_f)
        else:
            w_sh, w_sc, b_sh, b_sc1 = mod
            fcc = ctx_f.shape[1]
            kernel = partial(_fused_adaptive_kernel, eps=self.eps, n_total=n_total, c=c)
            in_specs = [pl.BlockSpec((n_rows, fc), lambda i: (0, 0)),
                        pl.BlockSpec((n_rows, fcc), lambda i: (0, 0)),
                        pl.BlockSpec((1, fc), lambda i: (0, 0)),
                        pl.BlockSpec((1, fc), lambda i: (0, 0)),
                        pl.BlockSpec((fcc, fc), lambda i: (0, 0)),
                        pl.BlockSpec((fcc, fc), lambda i: (0, 0)),
                        pl.BlockSpec((1, fc), lambda i: (0, 0)),
                        pl.BlockSpec((1, fc), lambda i: (0, 0))]
            args = (feat_f, ctx_f, gamma_f, beta_f, w_sh, w_sc, b_sh, b_sc1)
        return pl.pallas_call(
            kernel,
            out_shape=jax.ShapeDtypeStruct((n_rows, fc), feat_f.dtype),
            grid=(1,),
            in_specs=in_specs,
            out_specs=pl.BlockSpec((n_rows, fc), lambda i: (0, 0)),
            compiler_params=pltpu.CompilerParams(
                dimension_semantics=("arbitrary",),
                vmem_limit_bytes=self._vmem_limit),
        )(*args)

    # ------------------------------- forward --------------------------------- #
    def __call__(self, feat, condition=None, context=None):
        n, c = feat.shape
        assert c == self.num_features
        if self.decouple:
            assert condition in self.conditions
            idx = self.conditions.index(condition)
        else:
            idx = 0

        # Lane-dense channel fold: view (N, C) as (N/fold, C*fold) so the channel
        # axis is a multiple of 128 lanes (unmasked loads/stores, half the vregs).
        fold = 128 // math.gcd(c, 128)
        if fold > 1 and n % fold != 0:
            fold = 1                        # ragged fallback: masked (unfolded) layout
        fc, n_rows = c * fold, n // fold
        feat_f = feat.reshape(n_rows, fc) if fold > 1 else feat
        gamma_f, beta_f = self._folded_affine(idx, fold)

        ctx_f, mod, ctx_bytes = None, None, 0
        if self.adaptive:
            assert context is not None
            cc = context.shape[1]
            ctx_f = context.reshape(n_rows, cc * fold) if fold > 1 else context
            mod = self._folded_modulation(fold)
            ctx_bytes = context.size * context.dtype.itemsize

        feat_bytes = feat.size * feat.dtype.itemsize
        total_io = 2 * feat_bytes + ctx_bytes               # feat in + out + ctx
        fused = (self.use_fused is not False) and (3 * total_io <= self._vmem_limit)

        if fused:
            out_f = self._fused_call(feat_f, gamma_f, beta_f, n, ctx_f, mod)
        else:
            a, b = self._stats_call(feat_f, gamma_f, beta_f, n)
            out_f = self._apply_call(feat_f, a, b, ctx_f, mod)

        return out_f.reshape(n, c) if fold > 1 else out_f


# --------------------------------------------------------------------------- #
# Pure-JAX reference (mirrors the PyTorch forward) for sanity checks
# --------------------------------------------------------------------------- #
def _reference(mod, feat, condition, context):
    idx = mod.conditions.index(condition) if mod.decouple else 0
    x = feat.astype(jnp.float32)
    mean = jnp.mean(x, axis=0, keepdims=True)
    var = jnp.mean((x - mean) ** 2, axis=0, keepdims=True)
    y = (x - mean) / jnp.sqrt(var + mod.eps) * mod.gammas[idx] + mod.betas[idx]
    if mod.adaptive:
        ctx = context.astype(jnp.float32)
        h = ctx * jax.nn.sigmoid(ctx)
        shift = jnp.dot(h, mod.w_shift, precision=jax.lax.Precision.HIGHEST) + mod.b_shift
        scale1 = jnp.dot(h, mod.w_scale, precision=jax.lax.Precision.HIGHEST) + mod.b_scale1
        y = y * scale1 + shift
    return y.astype(feat.dtype)


# --------------------------------------------------------------------------- #
if __name__ == "__main__":
    key = jax.random.PRNGKey(0)
    k1, k2, k3, k4, kp = jax.random.split(key, 5)
    C, CC = 64, 32                         # num_features, context_channels

    # 1) BN only, fused single-pass path, lane-folded layout (C=64 -> 128 lanes).
    feat1 = jax.random.normal(k1, (1024, C), jnp.float32)
    m1 = PDBatchNorm(C, context_channels=CC, decouple=True, adaptive=False)
    out1 = jax.block_until_ready(m1(feat1, condition="S3DIS"))
    ref1 = _reference(m1, feat1, "S3DIS", None)
    assert bool(jnp.allclose(out1, ref1, atol=1e-3, rtol=1e-3)), "BN-only (fused) mismatch"

    # 2) BN + adaptive modulation, two-pass path forced, ragged row tiling (N=1000).
    feat2 = jax.random.normal(k2, (1000, C), jnp.float32)
    ctx2 = jax.random.normal(k3, (1000, CC), jnp.float32)
    m2 = PDBatchNorm(C, context_channels=CC, decouple=True, adaptive=True,
                     key=kp, use_fused=False)
    out2 = jax.block_until_ready(m2(feat2, condition="ScanNet", context=ctx2))
    ref2 = _reference(m2, feat2, "ScanNet", ctx2)
    assert bool(jnp.allclose(out2, ref2, atol=5e-3, rtol=5e-3)), "adaptive (2-pass) mismatch"

    # 3) BN + adaptive modulation, fused single-pass path.
    feat3 = jax.random.normal(k2, (512, C), jnp.float32)
    ctx3 = jax.random.normal(k3, (512, CC), jnp.float32)
    m3 = PDBatchNorm(C, context_channels=CC, decouple=True, adaptive=True, key=kp)
    out3 = jax.block_until_ready(m3(feat3, condition="ScanNet", context=ctx3))
    ref3 = _reference(m3, feat3, "ScanNet", ctx3)
    assert bool(jnp.allclose(out3, ref3, atol=5e-3, rtol=5e-3)), "adaptive (fused) mismatch"

    # 4) bf16 features, two-pass path (16-row sublane packing, f32 accumulation).
    feat4 = jax.random.normal(k4, (1024, C), jnp.float32).astype(jnp.bfloat16)
    m4 = PDBatchNorm(C, context_channels=CC, decouple=True, adaptive=False,
                     use_fused=False)
    out4 = jax.block_until_ready(m4(feat4, condition="Structured3D"))
    ref4 = _reference(m4, feat4, "Structured3D", None)
    assert bool(jnp.allclose(out4.astype(jnp.float32), ref4.astype(jnp.float32),
                             atol=5e-2, rtol=5e-2)), "bf16 mismatch"

    # 5) Odd N -> lane fold falls back to the masked (unfolded) layout.
    feat5 = jax.random.normal(k1, (257, C), jnp.float32)
    out5 = jax.block_until_ready(m1(feat5, condition="ScanNet"))
    ref5 = _reference(m1, feat5, "ScanNet", None)
    assert bool(jnp.allclose(out5, ref5, atol=1e-3, rtol=1e-3)), "fold-fallback mismatch"

    print("KERNEL_OK")
</pallas_src>

<mosaic_0001>
module attributes {stable_mosaic.version = 11 : i64} {
  func.func @_fused_kernel(%arg0: i32, %arg1: memref<512x128xf32, #tpu.memory_space<vmem>>, %arg2: memref<1x128xf32, #tpu.memory_space<vmem>>, %arg3: memref<1x128xf32, #tpu.memory_space<vmem>>, %arg4: memref<512x128xf32, #tpu.memory_space<vmem>>) attributes {dimension_semantics = [#tpu.dimension_semantics<arbitrary>], iteration_bounds = array<i64: 1>, scalar_prefetch = 0 : i64, scratch_operands = 0 : i64, tpu.core_type = #tpu.core_type<tc>, window_params = [{pipeline_mode = #tpu.pipeline_mode<synchronous>, transform_indices = @transform_0, window_bounds = array<i64: 512, 128>}, {pipeline_mode = #tpu.pipeline_mode<synchronous>, transform_indices = @transform_1, window_bounds = array<i64: 1, 128>}, {pipeline_mode = #tpu.pipeline_mode<synchronous>, transform_indices = @transform_2, window_bounds = array<i64: 1, 128>}, {pipeline_mode = #tpu.pipeline_mode<synchronous>, transform_indices = @transform_3, window_bounds = array<i64: 512, 128>}]} {
    %c0 = arith.constant 0 : index
    %c0_0 = arith.constant 0 : index
    %0 = vector.load %arg1[%c0, %c0_0] : memref<512x128xf32, #tpu.memory_space<vmem>>, vector<512x128xf32>
    %cst = arith.constant dense<0.000000e+00> : vector<128xf32>
    %1 = vector.multi_reduction <add>, %0, %cst [0] : vector<512x128xf32> to vector<128xf32>
    %2 = vector.shape_cast %1 : vector<128xf32> to vector<1x128xf32>
    %3 = arith.mulf %0, %0 : vector<512x128xf32>
    %cst_1 = arith.constant dense<0.000000e+00> : vector<128xf32>
    %4 = vector.multi_reduction <add>, %3, %cst_1 [0] : vector<512x128xf32> to vector<128xf32>
    %5 = vector.shape_cast %4 : vector<128xf32> to vector<1x128xf32>
    %c0_2 = arith.constant 0 : index
    %c0_3 = arith.constant 0 : index
    %6 = vector.load %arg2[%c0_2, %c0_3] : memref<1x128xf32, #tpu.memory_space<vmem>>, vector<1x128xf32>
    %c0_4 = arith.constant 0 : index
    %c0_5 = arith.constant 0 : index
    %7 = vector.load %arg3[%c0_4, %c0_5] : memref<1x128xf32, #tpu.memory_space<vmem>>, vector<1x128xf32>
    %c64_i32 = arith.constant 64 : i32
    %8 = tpu.dynamic_rotate %2 by %c64_i32 dim 1 : vector<1x128xf32>, i32 -> vector<1x128xf32>
    %9 = arith.addf %2, %8 : vector<1x128xf32>
    %c64_i32_6 = arith.constant 64 : i32
    %10 = tpu.dynamic_rotate %5 by %c64_i32_6 dim 1 : vector<1x128xf32>, i32 -> vector<1x128xf32>
    %11 = arith.addf %5, %10 : vector<1x128xf32>
    %cst_7 = arith.constant 9.765625E-4 : f32
    %12 = vector.broadcast %cst_7 : f32 to vector<1x128xf32>
    %13 = arith.mulf %9, %12 : vector<1x128xf32>
    %cst_8 = arith.constant 9.765625E-4 : f32
    %14 = vector.broadcast %cst_8 : f32 to vector<1x128xf32>
    %15 = arith.mulf %11, %14 : vector<1x128xf32>
    %16 = arith.mulf %13, %13 : vector<1x128xf32>
    %17 = arith.subf %15, %16 : vector<1x128xf32>
    %cst_9 = arith.constant 0.000000e+00 : f32
    %18 = vector.broadcast %cst_9 : f32 to vector<1x128xf32>
    %19 = arith.maximumf %17, %18 : vector<1x128xf32>
    %cst_10 = arith.constant 1.000000e-03 : f32
    %20 = vector.broadcast %cst_10 : f32 to vector<1x128xf32>
    %21 = arith.addf %19, %20 : vector<1x128xf32>
    %22 = math.rsqrt %21 : vector<1x128xf32>
    %23 = arith.mulf %6, %22 : vector<1x128xf32>
    %24 = arith.mulf %13, %23 : vector<1x128xf32>
    %25 = arith.subf %7, %24 : vector<1x128xf32>
    %c0_11 = arith.constant 0 : index
    %c0_12 = arith.constant 0 : index
    %26 = vector.load %arg1[%c0_11, %c0_12] : memref<512x128xf32, #tpu.memory_space<vmem>>, vector<512x128xf32>
    %27 = vector.broadcast %23 : vector<1x128xf32> to vector<512x128xf32>
    %28 = arith.mulf %26, %27 : vector<512x128xf32>
    %29 = vector.broadcast %25 : vector<1x128xf32> to vector<512x128xf32>
    %30 = arith.addf %28, %29 : vector<512x128xf32>
    %c0_13 = arith.constant 0 : index
    %c0_14 = arith.constant 0 : index
    %31 = vector.load %arg4[%c0_13, %c0_14] : memref<512x128xf32, #tpu.memory_space<vmem>>, vector<512x128xf32>
    tpu.vector_store %arg4[%c0_13, %c0_14], %30 {strides = array<i32>} : memref<512x128xf32, #tpu.memory_space<vmem>>, vector<512x128xf32>,
    return
  }
  func.func @transform_0(%arg0: i32) -> (i32, i32) {
    %c0_i32 = arith.constant 0 : i32
    %c0_i32_0 = arith.constant 0 : i32
    %c0_i32_1 = arith.constant 0 : i32
    return %c0_i32, %c0_i32_0 : i32, i32
  }
  func.func @transform_1(%arg0: i32) -> (i32, i32) {
    %c0_i32 = arith.constant 0 : i32
    %c0_i32_0 = arith.constant 0 : i32
    %c0_i32_1 = arith.constant 0 : i32
    return %c0_i32, %c0_i32_0 : i32, i32
  }
  func.func @transform_2(%arg0: i32) -> (i32, i32) {
    %c0_i32 = arith.constant 0 : i32
    %c0_i32_0 = arith.constant 0 : i32
    %c0_i32_1 = arith.constant 0 : i32
    return %c0_i32, %c0_i32_0 : i32, i32
  }
  func.func @transform_3(%arg0: i32) -> (i32, i32) {
    %c0_i32 = arith.constant 0 : i32
    %c0_i32_0 = arith.constant 0 : i32
    %c0_i32_1 = arith.constant 0 : i32
    return %c0_i32, %c0_i32_0 : i32, i32
  }
}

</mosaic_0001>

<bundles_post_ra>
// kernel: tpu_custom_call.1
= control target key start
LH: loop header
LB: loop body
LE: loop exit
PB: predicated region body
PF: predicated region fallthrough
CT: control target
= control target key end

     0   :  { %8 = vsyncpa [#allocation3], 0  ;;  %s1349_s0 = inlined_call_operand.hbm [shape: f32[512,128], index: 0, kind: input, shape index: {}]   ;;  %s1350_s1 = inlined_call_operand.vmem [shape: f32[1,128], index: 1, kind: input, shape index: {}]   ;;  %s1351_s2 = inlined_call_operand.vmem [shape: f32[1,128], index: 2, kind: input, shape index: {}]   ;;  %s1352_s3 = inlined_call_operand.hbm [shape: f32[512,128], index: 3, kind: output, shape index: {}]  }
   0x1   :  { %9 = vsyncpa [#allocation4], 0  ;;  %s585_s12 = smov [#allocation2]  }
   0x2   :  { %s15_s13 = sshll.u32 %s585_s12, 4  ;;  %s16_s13 = int_to_ptr.vmem [resolvable:$true] %s15_s13 }
   0x3   :  { %s549_s14 = scalar_lea.vmem %s16_s13, 8192  ;;  %p554_p1 = scmp.lt.s32.totalorder %s16_s13, %s16_s13 }
   0x4   :  { %p550_p0 = scmp.ne.s32.totalorder %s16_s13, %s549_s14  ;;  %p555_p2 = scmp.lt.s32.totalorder %s549_s14, %s549_s14 }
   0x6   :  { %p556_p3 = por %p555_p2, %p554_p1 }
   0x8   :  { %p557_p4 = pnand %p556_p3, %p550_p0 }
   0xa   :  { %560 = shalt.err (!%p557_p4)
}
   0xb   :  { %s586_s15 = smov 128   ;;  %s587_s16 = smov 8  }
   0xc   :  { %21 = dma.hbm_to_vmem [thread:$0]  %s1349_s0, 8192, %s16_s13, [#allocation3], %s586_s15, %s586_s15, %s587_s16  }
   0xd   :  { %581 = dma.done.wait [#allocation3], 8192  }
   0xe   :  { %582 = vsyncadd [#allocation3], 4294959104  ;;  %v616_v0 = vld [vmem:[#allocation2] sm:$0xff]  ;;  %v618_v1 = vld [vmem:[#allocation2 + $0x8] sm:$0xff]  ;;  %s588_s0 = smov 64  }
   0xf   :  { %v620_v2 = vld [vmem:[#allocation2 + $0x10] sm:$0xff]  ;;  %v93_v3 = vadd.f32 %v618_v1, %v616_v0  ;;  %v162_v4 = vmul.f32 %v616_v0, %v616_v0  ;;  %v163_v5 = vmul.f32 %v618_v1, %v618_v1  ;;  %v628_v6 = vld [vmem:[#allocation2 + $0x18] sm:$0xff]  ;;  %v633_v9 = vld [vmem:[#allocation2 + $0x20] sm:$0xff] }
  0x10   :  { %v164_v7 = vmul.f32 %v620_v2, %v620_v2  ;;  %v165_v10 = vmul.f32 %v628_v6, %v628_v6  ;;  %v638_v13 = vld [vmem:[#allocation2 + $0x28] sm:$0xff]  ;;  %v166_v14 = vmul.f32 %v633_v9, %v633_v9  ;;  %v643_v17 = vld [vmem:[#allocation2 + $0x30] sm:$0xff]  ;;  %v648_v21 = vld [vmem:[#allocation2 + $0x38] sm:$0xff] }
  0x11   :  { %v94_v8 = vadd.f32 %v93_v3, %v620_v2  ;;  %v226_v11 = vadd.f32 %v163_v5, %v162_v4  ;;  %v167_v18 = vmul.f32 %v638_v13, %v638_v13  ;;  %v168_v22 = vmul.f32 %v643_v17, %v643_v17  ;;  %v653_v25 = vld [vmem:[#allocation2 + $0x40] sm:$0xff]  ;;  %v658_v29 = vld [vmem:[#allocation2 + $0x48] sm:$0xff]  ;;  %v663_v33 = vld [vmem:[#allocation2 + $0x50] sm:$0xff] }
  0x12   :  { %v169_v26 = vmul.f32 %v648_v21, %v648_v21  ;;  %v170_v30 = vmul.f32 %v653_v25, %v653_v25  ;;  %v171_v34 = vmul.f32 %v658_v29, %v658_v29  ;;  %v668_v37 = vld [vmem:[#allocation2 + $0x58] sm:$0xff]  ;;  %v172_v38 = vmul.f32 %v663_v33, %v663_v33  ;;  %v673_v41 = vld [vmem:[#allocation2 + $0x60] sm:$0xff]  ;;  %v678_v45 = vld [vmem:[#allocation2 + $0x68] sm:$0xff] }
  0x13   :  { %v95_v12 = vadd.f32 %v94_v8, %v628_v6  ;;  %v227_v15 = vadd.f32 %v226_v11, %v164_v7  ;;  %v173_v42 = vmul.f32 %v668_v37, %v668_v37  ;;  %v174_v46 = vmul.f32 %v673_v41, %v673_v41  ;;  %v683_v49 = vld [vmem:[#allocation2 + $0x70] sm:$0xff]  ;;  %v688_v53 = vld [vmem:[#allocation2 + $0x78] sm:$0xff]  ;;  %v693_v57 = vld [vmem:[#allocation2 + $0x80] sm:$0xff] }
  0x14   :  { %v175_v50 = vmul.f32 %v678_v45, %v678_v45  ;;  %v176_v54 = vmul.f32 %v683_v49, %v683_v49  ;;  %v177_v58 = vmul.f32 %v688_v53, %v688_v53  ;;  %v698_v61 = vld [vmem:[#allocation2 + $0x88] sm:$0xff]  ;;  %v178_v62 = vmul.f32 %v693_v57, %v693_v57  ;;  %v703_v4 = vld [vmem:[#allocation2 + $0x90] sm:$0xff] }
  0x15   :  { %v96_v16 = vadd.f32 %v95_v12, %v633_v9  ;;  %v228_v19 = vadd.f32 %v227_v15, %v165_v10  ;;  %v179_v5 = vmul.f32 %v698_v61, %v698_v61  ;;  %v708_v10 = vld [vmem:[#allocation2 + $0x98] sm:$0xff]  ;;  %v180_v11 = vmul.f32 %v703_v4, %v703_v4  ;;  %v713_v15 = vld [vmem:[#allocation2 + $0xa0] sm:$0xff] }
  0x17   :  { %v97_v20 = vadd.f32 %v96_v16, %v638_v13  ;;  %v229_v23 = vadd.f32 %v228_v19, %v166_v14  ;;  %v181_v16 = vmul.f32 %v708_v10, %v708_v10 }
  0x19   :  { %v98_v24 = vadd.f32 %v97_v20, %v643_v17  ;;  %v230_v27 = vadd.f32 %v229_v23, %v167_v18  ;;  %v718_v20 = vld [vmem:[#allocation2 + $0xa8] sm:$0xff] }
  0x1b   :  { %v99_v28 = vadd.f32 %v98_v24, %v648_v21  ;;  %v231_v31 = vadd.f32 %v230_v27, %v168_v22  ;;  %v182_v22 = vmul.f32 %v713_v15, %v713_v15  ;;  %v183_v27 = vmul.f32 %v718_v20, %v718_v20 }
  0x1d   :  { %v100_v32 = vadd.f32 %v99_v28, %v653_v25  ;;  %v232_v35 = vadd.f32 %v231_v31, %v169_v26  ;;  %v723_v26 = vld [vmem:[#allocation2 + $0xb0] sm:$0xff]  ;;  %v728_v31 = vld [vmem:[#allocation2 + $0xb8] sm:$0xff] }
  0x1f   :  { %v101_v36 = vadd.f32 %v100_v32, %v658_v29  ;;  %v233_v39 = vadd.f32 %v232_v35, %v170_v30  ;;  %v184_v32 = vmul.f32 %v723_v26, %v723_v26 }
  0x21   :  { %v102_v40 = vadd.f32 %v101_v36, %v663_v33  ;;  %v234_v43 = vadd.f32 %v233_v39, %v171_v34  ;;  %v733_v36 = vld [vmem:[#allocation2 + $0xc0] sm:$0xff] }
  0x23   :  { %v103_v44 = vadd.f32 %v102_v40, %v668_v37  ;;  %v235_v47 = vadd.f32 %v234_v43, %v172_v38  ;;  %v185_v38 = vmul.f32 %v728_v31, %v728_v31  ;;  %v186_v43 = vmul.f32 %v733_v36, %v733_v36 }
  0x25   :  { %v104_v48 = vadd.f32 %v103_v44, %v673_v41  ;;  %v236_v51 = vadd.f32 %v235_v47, %v173_v42  ;;  %v738_v42 = vld [vmem:[#allocation2 + $0xc8] sm:$0xff]  ;;  %v743_v47 = vld [vmem:[#allocation2 + $0xd0] sm:$0xff] }
  0x27   :  { %v105_v52 = vadd.f32 %v104_v48, %v678_v45  ;;  %v237_v55 = vadd.f32 %v236_v51, %v174_v46  ;;  %v187_v48 = vmul.f32 %v738_v42, %v738_v42 }
  0x29   :  { %v106_v56 = vadd.f32 %v105_v52, %v683_v49  ;;  %v238_v59 = vadd.f32 %v237_v55, %v175_v50  ;;  %v748_v52 = vld [vmem:[#allocation2 + $0xd8] sm:$0xff] }
  0x2b   :  { %v107_v60 = vadd.f32 %v106_v56, %v688_v53  ;;  %v239_v63 = vadd.f32 %v238_v59, %v176_v54  ;;  %v188_v54 = vmul.f32 %v743_v47, %v743_v47  ;;  %v189_v59 = vmul.f32 %v748_v52, %v748_v52 }
  0x2d   :  { %v108_v3 = vadd.f32 %v107_v60, %v693_v57  ;;  %v240_v7 = vadd.f32 %v239_v63, %v177_v58  ;;  %v753_v58 = vld [vmem:[#allocation2 + $0xe0] sm:$0xff]  ;;  %v758_v63 = vld [vmem:[#allocation2 + $0xe8] sm:$0xff] }
  0x2f   :  { %v109_v8 = vadd.f32 %v108_v3, %v698_v61  ;;  %v241_v12 = vadd.f32 %v240_v7, %v178_v62  ;;  %v190_v3 = vmul.f32 %v753_v58, %v753_v58 }
  0x31   :  { %v110_v14 = vadd.f32 %v109_v8, %v703_v4  ;;  %v242_v18 = vadd.f32 %v241_v12, %v179_v5  ;;  %v763_v8 = vld [vmem:[#allocation2 + $0xf0] sm:$0xff] }
  0x33   :  { %v111_v19 = vadd.f32 %v110_v14, %v708_v10  ;;  %v243_v23 = vadd.f32 %v242_v18, %v180_v11  ;;  %v191_v11 = vmul.f32 %v758_v63, %v758_v63  ;;  %v192_v18 = vmul.f32 %v763_v8, %v763_v8 }
  0x35   :  { %v112_v24 = vadd.f32 %v111_v19, %v713_v15  ;;  %v244_v28 = vadd.f32 %v243_v23, %v181_v16  ;;  %v768_v16 = vld [vmem:[#allocation2 + $0xf8] sm:$0xff]  ;;  %v773_v23 = vld [vmem:[#allocation2 + $0x100] sm:$0xff] }
  0x37   :  { %v113_v30 = vadd.f32 %v112_v24, %v718_v20  ;;  %v245_v34 = vadd.f32 %v244_v28, %v182_v22  ;;  %v193_v24 = vmul.f32 %v768_v16, %v768_v16 }
  0x39   :  { %v114_v35 = vadd.f32 %v113_v30, %v723_v26  ;;  %v246_v39 = vadd.f32 %v245_v34, %v183_v27  ;;  %v778_v30 = vld [vmem:[#allocation2 + $0x108] sm:$0xff] }
  0x3b   :  { %v115_v40 = vadd.f32 %v114_v35, %v728_v31  ;;  %v247_v44 = vadd.f32 %v246_v39, %v184_v32  ;;  %v194_v32 = vmul.f32 %v773_v23, %v773_v23  ;;  %v195_v39 = vmul.f32 %v778_v30, %v778_v30 }
  0x3d   :  { %v116_v46 = vadd.f32 %v115_v40, %v733_v36  ;;  %v248_v50 = vadd.f32 %v247_v44, %v185_v38  ;;  %v783_v38 = vld [vmem:[#allocation2 + $0x110] sm:$0xff]  ;;  %v788_v44 = vld [vmem:[#allocation2 + $0x118] sm:$0xff] }
  0x3f   :  { %v117_v51 = vadd.f32 %v116_v46, %v738_v42  ;;  %v249_v55 = vadd.f32 %v248_v50, %v186_v43  ;;  %v196_v46 = vmul.f32 %v783_v38, %v783_v38 }
  0x41   :  { %v118_v56 = vadd.f32 %v117_v51, %v743_v47  ;;  %v250_v60 = vadd.f32 %v249_v55, %v187_v48  ;;  %v793_v51 = vld [vmem:[#allocation2 + $0x120] sm:$0xff] }
  0x43   :  { %v119_v62 = vadd.f32 %v118_v56, %v748_v52  ;;  %v251_v5 = vadd.f32 %v250_v60, %v188_v54  ;;  %v197_v54 = vmul.f32 %v788_v44, %v788_v44  ;;  %v198_v60 = vmul.f32 %v793_v51, %v793_v51 }
  0x45   :  { %v120_v7 = vadd.f32 %v119_v62, %v753_v58  ;;  %v252_v12 = vadd.f32 %v251_v5, %v189_v59  ;;  %v798_v59 = vld [vmem:[#allocation2 + $0x128] sm:$0xff]  ;;  %v803_v5 = vld [vmem:[#allocation2 + $0x130] sm:$0xff] }
  0x47   :  { %v121_v14 = vadd.f32 %v120_v7, %v758_v63  ;;  %v253_v19 = vadd.f32 %v252_v12, %v190_v3  ;;  %v199_v7 = vmul.f32 %v798_v59, %v798_v59 }
  0x49   :  { %v122_v22 = vadd.f32 %v121_v14, %v763_v8  ;;  %v254_v27 = vadd.f32 %v253_v19, %v191_v11  ;;  %v808_v14 = vld [vmem:[#allocation2 + $0x138] sm:$0xff] }
  0x4b   :  { %v123_v28 = vadd.f32 %v122_v22, %v768_v16  ;;  %v255_v34 = vadd.f32 %v254_v27, %v192_v18  ;;  %v200_v18 = vmul.f32 %v803_v5, %v803_v5  ;;  %v201_v27 = vmul.f32 %v808_v14, %v808_v14 }
  0x4d   :  { %v124_v35 = vadd.f32 %v123_v28, %v773_v23  ;;  %v256_v40 = vadd.f32 %v255_v34, %v193_v24  ;;  %v813_v24 = vld [vmem:[#allocation2 + $0x140] sm:$0xff]  ;;  %v818_v34 = vld [vmem:[#allocation2 + $0x148] sm:$0xff] }
  0x4e   :  { %1375 = vst [vmem:[#allocation8_spill] sm:$0xff] %v818_v34 }
  0x4f   :  { %v125_v43 = vadd.f32 %v124_v35, %v778_v30  ;;  %v257_v48 = vadd.f32 %v256_v40, %v194_v32  ;;  %v202_v35 = vmul.f32 %v813_v24, %v813_v24 }
  0x51   :  { %v126_v50 = vadd.f32 %v125_v43, %v783_v38  ;;  %v258_v55 = vadd.f32 %v257_v48, %v195_v39  ;;  %v823_v43 = vld [vmem:[#allocation2 + $0x150] sm:$0xff] }
  0x52   :  { %1376 = vst [vmem:[#allocation9_spill] sm:$0xff] %v823_v43 }
  0x53   :  { %v127_v56 = vadd.f32 %v126_v50, %v788_v44  ;;  %v259_v62 = vadd.f32 %v258_v55, %v196_v46  ;;  %v203_v46 = vmul.f32 %v818_v34, %v818_v34  ;;  %v204_v55 = vmul.f32 %v823_v43, %v823_v43 }
  0x55   :  { %v128_v3 = vadd.f32 %v127_v56, %v793_v51  ;;  %v260_v11 = vadd.f32 %v259_v62, %v197_v54  ;;  %v828_v54 = vld [vmem:[#allocation2 + $0x158] sm:$0xff]  ;;  %v833_v62 = vld [vmem:[#allocation2 + $0x160] sm:$0xff] }
  0x56   :  { %1377 = vst [vmem:[#allocation10_spill] sm:$0xff] %v828_v54  ;;  %1378 = vst [vmem:[#allocation11_spill] sm:$0xff] %v833_v62 }
  0x57   :  { %v129_v12 = vadd.f32 %v128_v3, %v798_v59  ;;  %v261_v19 = vadd.f32 %v260_v11, %v198_v60  ;;  %v205_v3 = vmul.f32 %v828_v54, %v828_v54 }
  0x59   :  { %v130_v22 = vadd.f32 %v129_v12, %v803_v5  ;;  %v262_v28 = vadd.f32 %v261_v19, %v199_v7  ;;  %v838_v12 = vld [vmem:[#allocation2 + $0x168] sm:$0xff] }
  0x5a   :  { %1379 = vst [vmem:[#allocation12_spill] sm:$0xff] %v838_v12 }
  0x5b   :  { %v131_v32 = vadd.f32 %v130_v22, %v808_v14  ;;  %v263_v39 = vadd.f32 %v262_v28, %v200_v18  ;;  %v206_v18 = vmul.f32 %v833_v62, %v833_v62  ;;  %v207_v28 = vmul.f32 %v838_v12, %v838_v12 }
  0x5d   :  { %v132_v40 = vadd.f32 %v131_v32, %v813_v24  ;;  %v264_v48 = vadd.f32 %v263_v39, %v201_v27  ;;  %v843_v27 = vld [vmem:[#allocation2 + $0x170] sm:$0xff]  ;;  %v848_v39 = vld [vmem:[#allocation2 + $0x178] sm:$0xff] }
  0x5e   :  { %1380 = vst [vmem:[#allocation13_spill] sm:$0xff] %v843_v27  ;;  %1381 = vst [vmem:[#allocation14_spill] sm:$0xff] %v848_v39 }
  0x5f   :  { %v133_v50 = vadd.f32 %v132_v40, %v818_v34  ;;  %v265_v56 = vadd.f32 %v264_v48, %v202_v35  ;;  %v208_v40 = vmul.f32 %v843_v27, %v843_v27 }
  0x61   :  { %v134_v60 = vadd.f32 %v133_v50, %v823_v43  ;;  %v266_v7 = vadd.f32 %v265_v56, %v203_v46  ;;  %v853_v50 = vld [vmem:[#allocation2 + $0x180] sm:$0xff] }
  0x62   :  { %1382 = vst [vmem:[#allocation15_spill] sm:$0xff] %v853_v50 }
  0x63   :  { %v135_v11 = vadd.f32 %v134_v60, %v828_v54  ;;  %v267_v19 = vadd.f32 %v266_v7, %v204_v55  ;;  %v209_v55 = vmul.f32 %v848_v39, %v848_v39  ;;  %v858_v7 = vld [vmem:[#allocation2 + $0x188] sm:$0xff] }
  0x64   :  { %1383 = vst [vmem:[#allocation16_spill] sm:$0xff] %v858_v7 }
  0x65   :  { %v136_v22 = vadd.f32 %v135_v11, %v833_v62  ;;  %v268_v32 = vadd.f32 %v267_v19, %v205_v3  ;;  %v210_v3 = vmul.f32 %v853_v50, %v853_v50 }
  0x67   :  { %v137_v35 = vadd.f32 %v136_v22, %v838_v12  ;;  %v269_v46 = vadd.f32 %v268_v32, %v206_v18  ;;  %v863_v22 = vld [vmem:[#allocation2 + $0x190] sm:$0xff]  ;;  %v211_v18 = vmul.f32 %v858_v7, %v858_v7 }
  0x68   :  { %1384 = vst [vmem:[#allocation17_spill] sm:$0xff] %v863_v22 }
  0x69   :  { %v138_v48 = vadd.f32 %v137_v35, %v843_v27  ;;  %v270_v56 = vadd.f32 %v269_v46, %v207_v28  ;;  %v868_v27 = vld [vmem:[#allocation2 + $0x198] sm:$0xff]  ;;  %v212_v28 = vmul.f32 %v863_v22, %v863_v22 }
  0x6a   :  { %1385 = vst [vmem:[#allocation18_spill] sm:$0xff] %v868_v27 }
  0x6b   :  { %v139_v60 = vadd.f32 %v138_v48, %v848_v39  ;;  %v271_v11 = vadd.f32 %v270_v56, %v208_v40  ;;  %v873_v39 = vld [vmem:[#allocation2 + $0x1a0] sm:$0xff]  ;;  %v213_v40 = vmul.f32 %v868_v27, %v868_v27 }
  0x6c   :  { %1386 = vst [vmem:[#allocation19_spill] sm:$0xff] %v873_v39 }
  0x6d   :  { %v140_v19 = vadd.f32 %v139_v60, %v853_v50  ;;  %v272_v32 = vadd.f32 %v271_v11, %v209_v55  ;;  %v878_v50 = vld [vmem:[#allocation2 + $0x1a8] sm:$0xff]  ;;  %v214_v55 = vmul.f32 %v873_v39, %v873_v39 }
  0x6e   :  { %1387 = vst [vmem:[#allocation20_spill] sm:$0xff] %v878_v50 }
  0x6f   :  { %v141_v35 = vadd.f32 %v140_v19, %v858_v7  ;;  %v273_v46 = vadd.f32 %v272_v32, %v210_v3  ;;  %v883_v7 = vld [vmem:[#allocation2 + $0x1b0] sm:$0xff]  ;;  %v215_v3 = vmul.f32 %v878_v50, %v878_v50 }
  0x70   :  { %1388 = vst [vmem:[#allocation21_spill] sm:$0xff] %v883_v7 }
  0x71   :  { %v142_v48 = vadd.f32 %v141_v35, %v863_v22  ;;  %v274_v56 = vadd.f32 %v273_v46, %v211_v18  ;;  %v888_v22 = vld [vmem:[#allocation2 + $0x1b8] sm:$0xff]  ;;  %v216_v18 = vmul.f32 %v883_v7, %v883_v7 }
  0x72   :  { %1389 = vst [vmem:[#allocation22_spill] sm:$0xff] %v888_v22 }
  0x73   :  { %v143_v60 = vadd.f32 %v142_v48, %v868_v27  ;;  %v275_v11 = vadd.f32 %v274_v56, %v212_v28  ;;  %v893_v27 = vld [vmem:[#allocation2 + $0x1c0] sm:$0xff]  ;;  %v217_v28 = vmul.f32 %v888_v22, %v888_v22 }
  0x74   :  { %1390 = vst [vmem:[#allocation23_spill] sm:$0xff] %v893_v27 }
  0x75   :  { %v144_v19 = vadd.f32 %v143_v60, %v873_v39  ;;  %v276_v32 = vadd.f32 %v275_v11, %v213_v40  ;;  %v898_v39 = vld [vmem:[#allocation2 + $0x1c8] sm:$0xff]  ;;  %v218_v40 = vmul.f32 %v893_v27, %v893_v27 }
  0x76   :  { %1391 = vst [vmem:[#allocation24_spill] sm:$0xff] %v898_v39 }
  0x77   :  { %v145_v35 = vadd.f32 %v144_v19, %v878_v50  ;;  %v277_v46 = vadd.f32 %v276_v32, %v214_v55  ;;  %v903_v50 = vld [vmem:[#allocation2 + $0x1d0] sm:$0xff]  ;;  %v219_v55 = vmul.f32 %v898_v39, %v898_v39 }
  0x78   :  { %1392 = vst [vmem:[#allocation25_spill] sm:$0xff] %v903_v50 }
  0x79   :  { %v146_v48 = vadd.f32 %v145_v35, %v883_v7  ;;  %v278_v56 = vadd.f32 %v277_v46, %v215_v3  ;;  %v908_v7 = vld [vmem:[#allocation2 + $0x1d8] sm:$0xff]  ;;  %v220_v3 = vmul.f32 %v903_v50, %v903_v50 }
  0x7a   :  { %1393 = vst [vmem:[#allocation26_spill] sm:$0xff] %v908_v7 }
  0x7b   :  { %v147_v60 = vadd.f32 %v146_v48, %v888_v22  ;;  %v279_v11 = vadd.f32 %v278_v56, %v216_v18  ;;  %v913_v22 = vld [vmem:[#allocation2 + $0x1e0] sm:$0xff]  ;;  %v221_v18 = vmul.f32 %v908_v7, %v908_v7 }
  0x7c   :  { %1394 = vst [vmem:[#allocation27_spill] sm:$0xff] %v913_v22 }
  0x7d   :  { %v148_v19 = vadd.f32 %v147_v60, %v893_v27  ;;  %v280_v32 = vadd.f32 %v279_v11, %v217_v28  ;;  %v918_v27 = vld [vmem:[#allocation2 + $0x1e8] sm:$0xff]  ;;  %v222_v28 = vmul.f32 %v913_v22, %v913_v22 }
  0x7e   :  { %1395 = vst [vmem:[#allocation28_spill] sm:$0xff] %v918_v27 }
  0x7f   :  { %v149_v35 = vadd.f32 %v148_v19, %v898_v39  ;;  %v281_v46 = vadd.f32 %v280_v32, %v218_v40  ;;  %v923_v39 = vld [vmem:[#allocation2 + $0x1f0] sm:$0xff]  ;;  %v223_v40 = vmul.f32 %v918_v27, %v918_v27 }
  0x81   :  { %v150_v48 = vadd.f32 %v149_v35, %v903_v50  ;;  %v282_v56 = vadd.f32 %v281_v46, %v219_v55  ;;  %v928_v50 = vld [vmem:[#allocation2 + $0x1f8] sm:$0xff]  ;;  %v224_v55 = vmul.f32 %v923_v39, %v923_v39 }
  0x83   :  { %v151_v60 = vadd.f32 %v150_v48, %v908_v7  ;;  %v283_v11 = vadd.f32 %v282_v56, %v220_v3  ;;  %v225_v3 = vmul.f32 %v928_v50, %v928_v50 }
  0x85   :  { %v152_v19 = vadd.f32 %v151_v60, %v913_v22  ;;  %v284_v32 = vadd.f32 %v283_v11, %v221_v18 }
  0x87   :  { %v153_v35 = vadd.f32 %v152_v19, %v918_v27  ;;  %v285_v46 = vadd.f32 %v284_v32, %v222_v28 }
  0x89   :  { %v154_v48 = vadd.f32 %v153_v35, %v923_v39  ;;  %v286_v56 = vadd.f32 %v285_v46, %v223_v40 }
  0x8b   :  { %v155_v60 = vadd.f32 %v154_v48, %v928_v50  ;;  %v287_v22 = vadd.f32 %v286_v56, %v224_v55 }
  0x8d   :  { %v156_v7 = vrot.slane %v155_v60, 4  ;;  %v288_v12 = vadd.f32 %v287_v22, %v225_v3 }
  0x8f   :  { %v157_v18 = vadd.f32 %v156_v7, %v155_v60  ;;  %v289_v11 = vrot.slane %v288_v12, 4 }
  0x91   :  { %v158_v19 = vrot.slane %v157_v18, 2  ;;  %v290_v27 = vadd.f32 %v289_v11, %v288_v12 }
  0x93   :  { %v159_v62 = vadd.f32 %v158_v19, %v157_v18  ;;  %v291_v54 = vrot.slane %v290_v27, 2  ;;  %v314_v18 = vlaneseq }
  0x95   :  { %v160_v43 = vrot.slane %v159_v62, 1  ;;  %v292_v34 = vadd.f32 %v291_v54, %v290_v27  ;;  %v936_v11 = vshrl.u32 %v314_v18, 7  ;;  %v945_v27 = vld [vmem:[%s1351_s2] sm:$0x1] }
  0x97   :  { %v161_v28 = vadd.f32 %v160_v43, %v159_v62  ;;  %v293_v32 = vrot.slane %v292_v34, 1  ;;  %v295_v43 = vld [vmem:[%s1350_s1] sm:$0x1]  ;;  %s589_s1 = smov [#allocation5]  }
  0x98   :  { %s522_s2 = sshll.u32 %s589_s1, 4  ;;  %s523_s2 = int_to_ptr.vmem [resolvable:$true] %s522_s2 }
  0x99   :  { %297 = vrot.lane.b32.xlu0 %v161_v28, %s588_s0  ;;  %v294_v35 = vadd.f32 %v293_v32, %v292_v34  ;;  %v1374_v34 = vsub.s32 0, %v936_v11  ;;  %s561_s23 = scalar_lea.vmem %s523_s2, 8192  ;;  %p566_p6 = scmp.lt.s32.totalorder %s523_s2, %s523_s2 }
  0x9a   :  { %p562_p5 = scmp.ne.s32.totalorder %s523_s2, %s561_s23  ;;  %p567_p7 = scmp.lt.s32.totalorder %s561_s23, %s561_s23 }
  0x9c   :  { %p568_p8 = por %p567_p7, %p566_p6 }
  0x9d   :  { %300 = vrot.lane.b32.xlu0 %v294_v35, %s588_s0 }
  0x9e   :  { %p569_p9 = pnand %p568_p8, %p562_p5 }
 0x10b   :  { %v298_v40 = vpop.permute.xlu0 %297 }
 0x10c   :  { %v299_v46 = vadd.f32 %v298_v40, %v161_v28 }
 0x10e   :  { %v303_v48 = vmul.f32 0.0009765625, %v299_v46 }
 0x10f   :  { %v301_v55 = vpop.permute.xlu0 %300 }
 0x110   :  { %v302_v56 = vadd.f32 %v301_v55, %v294_v35  ;;  %v305_v7 = vmul.f32 %v303_v48, %v303_v48 }
 0x112   :  { %v304_v22 = vmul.f32 0.0009765625, %v302_v56  ;;  %v1396_v56 = vld [vmem:[#allocation8_spill] sm:$0xff] }
 0x114   :  { %v306_v3 = vsub.f32 %v304_v22, %v305_v7  ;;  %v1397_v22 = vld [vmem:[#allocation9_spill] sm:$0xff]  ;;  %v1398_v7 = vld [vmem:[#allocation10_spill] sm:$0xff] }
 0x116   :  { %v307_v60 = vmax.f32 %v306_v3, 0.0  ;;  %v1399_v3 = vld [vmem:[#allocation11_spill] sm:$0xff] }
 0x118   :  { %v308_v12 = vadd.f32 0.001, %v307_v60  ;;  %v1400_v60 = vld [vmem:[#allocation12_spill] sm:$0xff] }
 0x11a   :  { %539 = vrsqrt.f32 %v308_v12  ;;  %v1401_v12 = vld [vmem:[#allocation13_spill] sm:$0xff] }
 0x127   :  { %v540_v54 = vpop.eup %539 }
 0x128   :  { %v310_v62 = vmul.f32 %v540_v54, %v295_v43  ;;  %v1402_v43 = vld [vmem:[#allocation14_spill] sm:$0xff] }
 0x12a   :  { %v947_v19 = vmul.f32 %v310_v62, %v303_v48  ;;  %v951_v28 = vrot.slane %v310_v62, %v1374_v34  ;;  %v1403_v62 = vld [vmem:[#allocation15_spill] sm:$0xff]  ;;  %v1413_v34 = vld [vmem:[#allocation20_spill] sm:$0xff] }
 0x12c   :  { %v312_v32 = vsub.f32 %v945_v27, %v947_v19  ;;  %v957_v35 = vmul.f32 %v951_v28, %v616_v0  ;;  %v961_v40 = vmul.f32 %v951_v28, %v618_v1  ;;  %v965_v46 = vmul.f32 %v951_v28, %v620_v2  ;;  %v1405_v19 = vld [vmem:[#allocation16_spill] sm:$0xff] }
 0x12d   :  { %v969_v48 = vmul.f32 %v951_v28, %v628_v6  ;;  %v973_v55 = vmul.f32 %v951_v28, %v633_v9  ;;  %v977_v0 = vmul.f32 %v951_v28, %v638_v13  ;;  %v981_v1 = vmul.f32 %v951_v28, %v643_v17 }
 0x12e   :  { %v985_v2 = vmul.f32 %v951_v28, %v648_v21  ;;  %v989_v6 = vmul.f32 %v951_v28, %v653_v25  ;;  %v993_v9 = vmul.f32 %v951_v28, %v658_v29  ;;  %v997_v13 = vmul.f32 %v951_v28, %v663_v33 }
 0x12f   :  { %v1001_v17 = vmul.f32 %v951_v28, %v668_v37  ;;  %v1005_v21 = vmul.f32 %v951_v28, %v673_v41  ;;  %v1009_v25 = vmul.f32 %v951_v28, %v678_v45  ;;  %v1013_v29 = vmul.f32 %v951_v28, %v683_v49 }
 0x130   :  { %v1017_v33 = vmul.f32 %v951_v28, %v688_v53  ;;  %v1021_v37 = vmul.f32 %v951_v28, %v693_v57  ;;  %v1025_v41 = vmul.f32 %v951_v28, %v698_v61  ;;  %v1029_v45 = vmul.f32 %v951_v28, %v703_v4 }
 0x131   :  { %v1033_v49 = vmul.f32 %v951_v28, %v708_v10  ;;  %v1037_v53 = vmul.f32 %v951_v28, %v713_v15  ;;  %v1041_v57 = vmul.f32 %v951_v28, %v718_v20  ;;  %v1045_v61 = vmul.f32 %v951_v28, %v723_v26 }
 0x132   :  { %v1049_v4 = vmul.f32 %v951_v28, %v728_v31  ;;  %v1053_v10 = vmul.f32 %v951_v28, %v733_v36  ;;  %v1057_v15 = vmul.f32 %v951_v28, %v738_v42  ;;  %v1061_v20 = vmul.f32 %v951_v28, %v743_v47 }
 0x133   :  { %v1065_v26 = vmul.f32 %v951_v28, %v748_v52  ;;  %v1069_v31 = vmul.f32 %v951_v28, %v753_v58  ;;  %v1073_v36 = vmul.f32 %v951_v28, %v758_v63  ;;  %v1077_v42 = vmul.f32 %v951_v28, %v763_v8 }
 0x134   :  { %v1081_v47 = vmul.f32 %v951_v28, %v768_v16  ;;  %v1085_v52 = vmul.f32 %v951_v28, %v773_v23  ;;  %v1089_v58 = vmul.f32 %v951_v28, %v778_v30  ;;  %v1093_v63 = vmul.f32 %v951_v28, %v783_v38 }
 0x135   :  { %v1097_v8 = vmul.f32 %v951_v28, %v788_v44  ;;  %v1101_v16 = vmul.f32 %v951_v28, %v793_v51  ;;  %v1105_v23 = vmul.f32 %v951_v28, %v798_v59  ;;  %v1109_v30 = vmul.f32 %v951_v28, %v803_v5 }
 0x136   :  { %v1113_v38 = vmul.f32 %v951_v28, %v808_v14  ;;  %v1117_v44 = vmul.f32 %v951_v28, %v813_v24  ;;  %v1121_v51 = vmul.f32 %v951_v28, %v1396_v56  ;;  %v1125_v59 = vmul.f32 %v951_v28, %v1397_v22  ;;  %v1407_v22 = vld [vmem:[#allocation17_spill] sm:$0xff] }
 0x137   :  { %v1129_v5 = vmul.f32 %v951_v28, %v1398_v7  ;;  %v1133_v14 = vmul.f32 %v951_v28, %v1399_v3  ;;  %v1137_v24 = vmul.f32 %v951_v28, %v1400_v60  ;;  %v1141_v18 = vmul.f32 %v951_v28, %v1401_v12  ;;  %v1409_v3 = vld [vmem:[#allocation18_spill] sm:$0xff]  ;;  %v1411_v12 = vld [vmem:[#allocation19_spill] sm:$0xff] }
 0x138   :  { %v1145_v54 = vmul.f32 %v951_v28, %v1402_v43  ;;  %v1149_v27 = vmul.f32 %v951_v28, %v1403_v62  ;;  %v1153_v56 = vmul.f32 %v951_v28, %v1405_v19  ;;  %v1157_v7 = vmul.f32 %v951_v28, %v1407_v22 }
 0x139   :  { %v1161_v60 = vmul.f32 %v951_v28, %v1409_v3  ;;  %v1165_v43 = vmul.f32 %v951_v28, %v1411_v12  ;;  %v1169_v62 = vmul.f32 %v951_v28, %v1413_v34 }
 0x13a   :  { %1404 = vst [vmem:[#allocation8_spill] sm:$0xff] %v1149_v27  ;;  %1406 = vst [vmem:[#allocation9_spill] sm:$0xff] %v1153_v56  ;;  %v1415_v27 = vld [vmem:[#allocation21_spill] sm:$0xff]  ;;  %v1417_v56 = vld [vmem:[#allocation22_spill] sm:$0xff] }
 0x13b   :  { %1408 = vst [vmem:[#allocation10_spill] sm:$0xff] %v1157_v7  ;;  %1410 = vst [vmem:[#allocation11_spill] sm:$0xff] %v1161_v60  ;;  %v1173_v19 = vmul.f32 %v951_v28, %v1415_v27  ;;  %v1177_v22 = vmul.f32 %v951_v28, %v1417_v56  ;;  %v1419_v7 = vld [vmem:[#allocation23_spill] sm:$0xff]  ;;  %v1421_v60 = vld [vmem:[#allocation24_spill] sm:$0xff] }
 0x13c   :  { %1412 = vst [vmem:[#allocation12_spill] sm:$0xff] %v1165_v43  ;;  %1414 = vst [vmem:[#allocation13_spill] sm:$0xff] %v1169_v62  ;;  %v1181_v3 = vmul.f32 %v951_v28, %v1419_v7  ;;  %v1185_v12 = vmul.f32 %v951_v28, %v1421_v60  ;;  %v1422_v43 = vld [vmem:[#allocation25_spill] sm:$0xff]  ;;  %v1423_v62 = vld [vmem:[#allocation26_spill] sm:$0xff] }
 0x13d   :  { %1416 = vst [vmem:[#allocation14_spill] sm:$0xff] %v1173_v19  ;;  %1418 = vst [vmem:[#allocation15_spill] sm:$0xff] %v1177_v22  ;;  %v1189_v34 = vmul.f32 %v951_v28, %v1422_v43  ;;  %v1193_v27 = vmul.f32 %v951_v28, %v1423_v62  ;;  %v1424_v19 = vsub.s32 0, %v936_v11  ;;  %v1425_v22 = vld [vmem:[#allocation27_spill] sm:$0xff]  ;;  %v1209_v43 = vmul.f32 %v951_v28, %v923_v39 }
 0x13e   :  { %1420 = vst [vmem:[#allocation16_spill] sm:$0xff] %v1181_v3  ;;  %v1201_v7 = vmul.f32 %v951_v28, %v1425_v22  ;;  %v1426_v3 = vld [vmem:[#allocation28_spill] sm:$0xff]  ;;  %v1213_v62 = vmul.f32 %v951_v28, %v928_v50 }
 0x13f   :  { %v1197_v56 = vrot.slane %v312_v32, %v1424_v19  ;;  %v1205_v60 = vmul.f32 %v951_v28, %v1426_v3 }
 0x141   :  { %v389_v11 = vadd.f32 %v1197_v56, %v957_v35  ;;  %v390_v32 = vadd.f32 %v1197_v56, %v961_v40  ;;  %v391_v19 = vadd.f32 %v1197_v56, %v965_v46  ;;  %v392_v22 = vadd.f32 %v1197_v56, %v969_v48 }
 0x142   :  { %v393_v39 = vadd.f32 %v1197_v56, %v973_v55  ;;  %v394_v3 = vadd.f32 %v1197_v56, %v977_v0  ;;  %v395_v50 = vadd.f32 %v1197_v56, %v981_v1  ;;  %v396_v28 = vadd.f32 %v1197_v56, %v985_v2 }
 0x143   :  { %v397_v35 = vadd.f32 %v1197_v56, %v989_v6  ;;  %v398_v40 = vadd.f32 %v1197_v56, %v993_v9  ;;  %v399_v46 = vadd.f32 %v1197_v56, %v997_v13  ;;  %v400_v48 = vadd.f32 %v1197_v56, %v1001_v17  ;;  %453 = vst [vmem:[#allocation5] sm:$0xff] %v389_v11 }
 0x144   :  { %454 = vst [vmem:[#allocation5 + $0x8] sm:$0xff] %v390_v32  ;;  %455 = vst [vmem:[#allocation5 + $0x10] sm:$0xff] %v391_v19  ;;  %v401_v55 = vadd.f32 %v1197_v56, %v1005_v21  ;;  %v402_v0 = vadd.f32 %v1197_v56, %v1009_v25  ;;  %v403_v1 = vadd.f32 %v1197_v56, %v1013_v29  ;;  %v1432_v19 = vld [vmem:[#allocation13_spill] sm:$0xff] }
 0x145   :  { %456 = vst [vmem:[#allocation5 + $0x18] sm:$0xff] %v392_v22  ;;  %v404_v2 = vadd.f32 %v1197_v56, %v1017_v33  ;;  %457 = vst [vmem:[#allocation5 + $0x20] sm:$0xff] %v393_v39  ;;  %v405_v6 = vadd.f32 %v1197_v56, %v1021_v37  ;;  %v406_v9 = vadd.f32 %v1197_v56, %v1025_v41  ;;  %v1433_v39 = vld [vmem:[#allocation14_spill] sm:$0xff] }
 0x146   :  { %458 = vst [vmem:[#allocation5 + $0x28] sm:$0xff] %v394_v3  ;;  %459 = vst [vmem:[#allocation5 + $0x30] sm:$0xff] %v395_v50  ;;  %v407_v13 = vadd.f32 %v1197_v56, %v1029_v45  ;;  %v408_v17 = vadd.f32 %v1197_v56, %v1033_v49  ;;  %v409_v21 = vadd.f32 %v1197_v56, %v1037_v53  ;;  %v1434_v50 = vld [vmem:[#allocation15_spill] sm:$0xff] }
 0x147   :  { %460 = vst [vmem:[#allocation5 + $0x38] sm:$0xff] %v396_v28  ;;  %461 = vst [vmem:[#allocation5 + $0x40] sm:$0xff] %v397_v35  ;;  %v410_v25 = vadd.f32 %v1197_v56, %v1041_v57  ;;  %v411_v29 = vadd.f32 %v1197_v56, %v1045_v61  ;;  %v412_v33 = vadd.f32 %v1197_v56, %v1049_v4  ;;  %v1435_v35 = vld [vmem:[#allocation16_spill] sm:$0xff] }
 0x148   :  { %462 = vst [vmem:[#allocation5 + $0x48] sm:$0xff] %v398_v40  ;;  %463 = vst [vmem:[#allocation5 + $0x50] sm:$0xff] %v399_v46  ;;  %v413_v37 = vadd.f32 %v1197_v56, %v1053_v10  ;;  %v414_v41 = vadd.f32 %v1197_v56, %v1057_v15  ;;  %v415_v45 = vadd.f32 %v1197_v56, %v1061_v20 }
 0x149   :  { %464 = vst [vmem:[#allocation5 + $0x58] sm:$0xff] %v400_v48  ;;  %465 = vst [vmem:[#allocation5 + $0x60] sm:$0xff] %v401_v55  ;;  %v416_v49 = vadd.f32 %v1197_v56, %v1065_v26  ;;  %v417_v53 = vadd.f32 %v1197_v56, %v1069_v31  ;;  %v418_v57 = vadd.f32 %v1197_v56, %v1073_v36 }
 0x14a   :  { %466 = vst [vmem:[#allocation5 + $0x68] sm:$0xff] %v402_v0  ;;  %467 = vst [vmem:[#allocation5 + $0x70] sm:$0xff] %v403_v1  ;;  %v419_v61 = vadd.f32 %v1197_v56, %v1077_v42  ;;  %v420_v4 = vadd.f32 %v1197_v56, %v1081_v47  ;;  %v421_v10 = vadd.f32 %v1197_v56, %v1085_v52 }
 0x14b   :  { %468 = vst [vmem:[#allocation5 + $0x78] sm:$0xff] %v404_v2  ;;  %469 = vst [vmem:[#allocation5 + $0x80] sm:$0xff] %v405_v6  ;;  %v422_v15 = vadd.f32 %v1197_v56, %v1089_v58  ;;  %v423_v20 = vadd.f32 %v1197_v56, %v1093_v63  ;;  %v424_v26 = vadd.f32 %v1197_v56, %v1097_v8 }
 0x14c   :  { %470 = vst [vmem:[#allocation5 + $0x88] sm:$0xff] %v406_v9  ;;  %471 = vst [vmem:[#allocation5 + $0x90] sm:$0xff] %v407_v13  ;;  %v425_v31 = vadd.f32 %v1197_v56, %v1101_v16  ;;  %v426_v36 = vadd.f32 %v1197_v56, %v1105_v23  ;;  %v427_v42 = vadd.f32 %v1197_v56, %v1109_v30 }
 0x14d   :  { %472 = vst [vmem:[#allocation5 + $0x98] sm:$0xff] %v408_v17  ;;  %473 = vst [vmem:[#allocation5 + $0xa0] sm:$0xff] %v409_v21  ;;  %v428_v47 = vadd.f32 %v1197_v56, %v1113_v38  ;;  %v429_v52 = vadd.f32 %v1197_v56, %v1117_v44  ;;  %v430_v58 = vadd.f32 %v1197_v56, %v1121_v51  ;;  %v1427_v44 = vld [vmem:[#allocation8_spill] sm:$0xff] }
 0x14e   :  { %474 = vst [vmem:[#allocation5 + $0xa8] sm:$0xff] %v410_v25  ;;  %475 = vst [vmem:[#allocation5 + $0xb0] sm:$0xff] %v411_v29  ;;  %v431_v63 = vadd.f32 %v1197_v56, %v1125_v59  ;;  %v432_v8 = vadd.f32 %v1197_v56, %v1129_v5  ;;  %v433_v16 = vadd.f32 %v1197_v56, %v1133_v14  ;;  %v1428_v59 = vld [vmem:[#allocation9_spill] sm:$0xff]  ;;  %v1429_v14 = vld [vmem:[#allocation10_spill] sm:$0xff] }
 0x14f   :  { %476 = vst [vmem:[#allocation5 + $0xb8] sm:$0xff] %v412_v33  ;;  %477 = vst [vmem:[#allocation5 + $0xc0] sm:$0xff] %v413_v37  ;;  %v434_v23 = vadd.f32 %v1197_v56, %v1137_v24  ;;  %v435_v30 = vadd.f32 %v1197_v56, %v1141_v18  ;;  %v436_v38 = vadd.f32 %v1197_v56, %v1145_v54  ;;  %v1430_v24 = vld [vmem:[#allocation11_spill] sm:$0xff]  ;;  %v1431_v18 = vld [vmem:[#allocation12_spill] sm:$0xff] }
 0x150   :  { %478 = vst [vmem:[#allocation5 + $0xc8] sm:$0xff] %v414_v41  ;;  %479 = vst [vmem:[#allocation5 + $0xd0] sm:$0xff] %v415_v45  ;;  %v437_v51 = vadd.f32 %v1197_v56, %v1427_v44  ;;  %v438_v5 = vadd.f32 %v1197_v56, %v1428_v59  ;;  %v439_v11 = vadd.f32 %v1197_v56, %v1429_v14 }
 0x151   :  { %480 = vst [vmem:[#allocation5 + $0xd8] sm:$0xff] %v416_v49  ;;  %481 = vst [vmem:[#allocation5 + $0xe0] sm:$0xff] %v417_v53  ;;  %v440_v32 = vadd.f32 %v1197_v56, %v1430_v24  ;;  %v441_v54 = vadd.f32 %v1197_v56, %v1431_v18  ;;  %v442_v22 = vadd.f32 %v1197_v56, %v1432_v19 }
 0x152   :  { %482 = vst [vmem:[#allocation5 + $0xe8] sm:$0xff] %v418_v57  ;;  %483 = vst [vmem:[#allocation5 + $0xf0] sm:$0xff] %v419_v61  ;;  %v443_v3 = vadd.f32 %v1197_v56, %v1433_v39  ;;  %v444_v28 = vadd.f32 %v1197_v56, %v1434_v50  ;;  %v445_v40 = vadd.f32 %v1197_v56, %v1435_v35 }
 0x153   :  { %484 = vst [vmem:[#allocation5 + $0xf8] sm:$0xff] %v420_v4  ;;  %485 = vst [vmem:[#allocation5 + $0x100] sm:$0xff] %v421_v10  ;;  %v446_v46 = vadd.f32 %v1197_v56, %v1185_v12  ;;  %v447_v48 = vadd.f32 %v1197_v56, %v1189_v34  ;;  %v448_v55 = vadd.f32 %v1197_v56, %v1193_v27 }
 0x154   :  { %486 = vst [vmem:[#allocation5 + $0x108] sm:$0xff] %v422_v15  ;;  %487 = vst [vmem:[#allocation5 + $0x110] sm:$0xff] %v423_v20  ;;  %v449_v0 = vadd.f32 %v1197_v56, %v1201_v7  ;;  %v450_v1 = vadd.f32 %v1197_v56, %v1205_v60  ;;  %v451_v2 = vadd.f32 %v1197_v56, %v1209_v43 }
 0x155   :  { %488 = vst [vmem:[#allocation5 + $0x118] sm:$0xff] %v424_v26  ;;  %489 = vst [vmem:[#allocation5 + $0x120] sm:$0xff] %v425_v31  ;;  %v452_v12 = vadd.f32 %v1197_v56, %v1213_v62 }
 0x156   :  { %490 = vst [vmem:[#allocation5 + $0x128] sm:$0xff] %v426_v36  ;;  %491 = vst [vmem:[#allocation5 + $0x130] sm:$0xff] %v427_v42 }
 0x157   :  { %492 = vst [vmem:[#allocation5 + $0x138] sm:$0xff] %v428_v47  ;;  %493 = vst [vmem:[#allocation5 + $0x140] sm:$0xff] %v429_v52 }
 0x158   :  { %494 = vst [vmem:[#allocation5 + $0x148] sm:$0xff] %v430_v58  ;;  %495 = vst [vmem:[#allocation5 + $0x150] sm:$0xff] %v431_v63 }
 0x159   :  { %496 = vst [vmem:[#allocation5 + $0x158] sm:$0xff] %v432_v8  ;;  %497 = vst [vmem:[#allocation5 + $0x160] sm:$0xff] %v433_v16 }
 0x15a   :  { %498 = vst [vmem:[#allocation5 + $0x168] sm:$0xff] %v434_v23  ;;  %499 = vst [vmem:[#allocation5 + $0x170] sm:$0xff] %v435_v30 }
 0x15b   :  { %500 = vst [vmem:[#allocation5 + $0x178] sm:$0xff] %v436_v38  ;;  %501 = vst [vmem:[#allocation5 + $0x180] sm:$0xff] %v437_v51 }
 0x15c   :  { %502 = vst [vmem:[#allocation5 + $0x188] sm:$0xff] %v438_v5  ;;  %503 = vst [vmem:[#allocation5 + $0x190] sm:$0xff] %v439_v11 }
 0x15d   :  { %504 = vst [vmem:[#allocation5 + $0x198] sm:$0xff] %v440_v32  ;;  %505 = vst [vmem:[#allocation5 + $0x1a0] sm:$0xff] %v441_v54 }
 0x15e   :  { %506 = vst [vmem:[#allocation5 + $0x1a8] sm:$0xff] %v442_v22  ;;  %507 = vst [vmem:[#allocation5 + $0x1b0] sm:$0xff] %v443_v3 }
 0x15f   :  { %508 = vst [vmem:[#allocation5 + $0x1b8] sm:$0xff] %v444_v28  ;;  %509 = vst [vmem:[#allocation5 + $0x1c0] sm:$0xff] %v445_v40 }
 0x160   :  { %510 = vst [vmem:[#allocation5 + $0x1c8] sm:$0xff] %v446_v46  ;;  %511 = vst [vmem:[#allocation5 + $0x1d0] sm:$0xff] %v447_v48 }
 0x161   :  { %512 = vst [vmem:[#allocation5 + $0x1d8] sm:$0xff] %v448_v55  ;;  %513 = vst [vmem:[#allocation5 + $0x1e0] sm:$0xff] %v449_v0 }
 0x162   :  { %514 = vst [vmem:[#allocation5 + $0x1e8] sm:$0xff] %v450_v1  ;;  %515 = vst [vmem:[#allocation5 + $0x1f0] sm:$0xff] %v451_v2 }
 0x163   :  { %516 = vst [vmem:[#allocation5 + $0x1f8] sm:$0xff] %v452_v12 }
 0x164   :  { %572 = shalt.err (!%p569_p9)
}
 0x165   :  { %528 = dma.vmem_to_hbm [thread:$0]  %s523_s2, 8192, %s1352_s3, [#allocation4], %s586_s15, %s586_s15, %s587_s16  }
 0x166   :  { %583 = dma.done.wait [#allocation4], 8192  }
 0x167   :  { %584 = vsyncadd [#allocation4], 4294959104 }
 0x168   :  { %532 = vsyncpa [#allocation3], 1 }
 0x169   :  { %533 = vsyncpa [#allocation4], 1 }

</bundles_post_ra>
